<compile_context>
chip_gen: v7x
topology: tpu7x:2x2x1
jax: 0.10.0
libtpu: 0.0.40
codegen_flags: <defaults>
</compile_context>

<pallas_src>
import functools

import jax
import jax.numpy as jnp
from jax import lax
from jax.experimental import pallas as pl
from jax.experimental.pallas import tpu as pltpu

_LANE = 128                              # lane width (last-dim padding target)
_SUBLANE = 8                             # sublane granularity for row tiling
_BLOCK_BUDGET_BYTES = 16 * 1024 * 1024   # budget for pipelined blocks + f32 temps
_VMEM_LIMIT_BYTES = 32 * 1024 * 1024     # explicit scoped-VMEM limit (v7x-safe)
_MAX_TILE_N = 2048                       # rows per grid step ceiling (2D kernel)
_MAX_TILE_S = 32768                      # lanes per grid step ceiling (3D kernel)


# ---------------------------------------------------------------------------
# In-kernel math helpers
# ---------------------------------------------------------------------------
def _pow_in_kernel(x, power):
    """x**power with cheap VPU-only paths for small integer powers."""
    if power == 2:
        return x * x
    if isinstance(power, int) and 1 <= power <= 8:
        xp = x
        for _ in range(power - 1):
            xp = xp * x
        return xp
    return jnp.power(x, power)


def _inv_root_in_kernel(s, power):
    """s**(-1/power) using EUP-friendly ops (rsqrt / reciprocal / exp+log)."""
    if power == 2:
        return lax.rsqrt(s)                       # single EUP op
    if power == 1:
        return pl.reciprocal(s, approx=True)      # EUP vrcp
    return jnp.exp(-jnp.log(s) * (1.0 / power))   # one exp/log pair on the EUP


# ---------------------------------------------------------------------------
# Kernels
# ---------------------------------------------------------------------------
def _normalize2d_kernel(x_ref, o_ref, *, power):
    # Block: (tile_n, D_pad); reduction over the lane axis (axis -1).
    x = x_ref[...].astype(jnp.float32)
    s = jnp.sum(_pow_in_kernel(x, power), axis=-1, keepdims=True)
    o_ref[...] = (x * _inv_root_in_kernel(s, power)).astype(o_ref.dtype)


def _normalize3d_kernel(x_ref, o_ref, *, power):
    # Block: (1, C, tile_s); reduction over the channel axis (axis 1).
    x = x_ref[...].astype(jnp.float32)
    s = jnp.sum(_pow_in_kernel(x, power), axis=1, keepdims=True)
    o_ref[...] = (x * _inv_root_in_kernel(s, power)).astype(o_ref.dtype)


# ---------------------------------------------------------------------------
# Tile-size selection
# ---------------------------------------------------------------------------
def _round_up(v, m):
    return ((v + m - 1) // m) * m


def _pick_tile_n(n_rows, d_pad, itemsize):
    """Largest row tile (2D kernel) whose pipelined VMEM footprint fits."""
    # 2x double-buffered input + 2x double-buffered output + ~2 f32 temps.
    per_row = d_pad * (4 * itemsize + 2 * 4)
    tile = _BLOCK_BUDGET_BYTES // max(per_row, 1)
    tile = min(int(tile), _MAX_TILE_N)
    tile = max(_SUBLANE, (tile // _SUBLANE) * _SUBLANE)

    n_pad = _round_up(n_rows, _SUBLANE)
    # Keep >=2 grid steps when possible so both v7x TensorCores stream HBM.
    if n_pad >= 2 * _SUBLANE:
        half = max(_SUBLANE, (n_pad // 2 // _SUBLANE) * _SUBLANE)
        tile = min(tile, half)
    tile = min(tile, n_pad)
    return max(_SUBLANE, tile)


def _pick_tile_s(batch, channels, s_pad, itemsize):
    """Largest lane tile (3D kernel) whose pipelined VMEM footprint fits."""
    per_col = channels * (4 * itemsize + 2 * 4)
    tile = _BLOCK_BUDGET_BYTES // max(per_col, 1)
    tile = min(int(tile), _MAX_TILE_S)
    tile = max(_LANE, (tile // _LANE) * _LANE)
    # If the batch axis alone cannot provide >=2 grid steps, split spatially.
    if batch < 2 and s_pad >= 2 * _LANE:
        half = max(_LANE, (s_pad // 2 // _LANE) * _LANE)
        tile = min(tile, half)
    tile = min(tile, s_pad)
    return max(_LANE, tile)


# ---------------------------------------------------------------------------
# Wrappers
# ---------------------------------------------------------------------------
def _normalize_2d(x, power):
    n, d = x.shape
    # Lane-dense stores: pad the feature axis to a multiple of 128 with zeros.
    # Zero padding leaves sum(x**p) unchanged, so the norm is exact.
    d_pad = _round_up(d, _LANE)
    x_in = jnp.pad(x, ((0, 0), (0, d_pad - d))) if d_pad != d else x

    tile_n = _pick_tile_n(n, d_pad, jnp.dtype(x.dtype).itemsize)
    grid = (pl.cdiv(n, tile_n),)   # partial last block handled by the BlockSpec

    kernel = functools.partial(_normalize2d_kernel, power=power)
    out = pl.pallas_call(
        kernel,
        out_shape=jax.ShapeDtypeStruct((n, d_pad), x.dtype),
        grid_spec=pltpu.PrefetchScalarGridSpec(
            num_scalar_prefetch=0,
            grid=grid,
            in_specs=[pl.BlockSpec((tile_n, d_pad), lambda i: (i, 0))],
            out_specs=pl.BlockSpec((tile_n, d_pad), lambda i: (i, 0)),
        ),
        compiler_params=pltpu.CompilerParams(
            dimension_semantics=("parallel",),
            vmem_limit_bytes=_VMEM_LIMIT_BYTES,
        ),
    )(x_in)

    if d_pad != d:
        out = out[:, :d]
    return out


def _normalize_nd(x, power):
    """ND (ndim >= 3): normalize over dim 1 with channels on the sublane side.

    Avoids transposes and avoids padding a small channel count up to 128.
    Padded spatial columns produce garbage (0/0) but are sliced off afterwards.
    """
    orig_shape = x.shape
    n, c = orig_shape[0], orig_shape[1]
    s = 1
    for dim in orig_shape[2:]:
        s *= dim
    x3 = x.reshape(n, c, s)

    s_pad = _round_up(s, _LANE)
    x_in = jnp.pad(x3, ((0, 0), (0, 0), (0, s_pad - s))) if s_pad != s else x3

    tile_s = _pick_tile_s(n, c, s_pad, jnp.dtype(x.dtype).itemsize)
    grid = (n, pl.cdiv(s_pad, tile_s))

    kernel = functools.partial(_normalize3d_kernel, power=power)
    out = pl.pallas_call(
        kernel,
        out_shape=jax.ShapeDtypeStruct((n, c, s_pad), x.dtype),
        grid_spec=pltpu.PrefetchScalarGridSpec(
            num_scalar_prefetch=0,
            grid=grid,
            in_specs=[pl.BlockSpec((1, c, tile_s), lambda i, j: (i, 0, j))],
            out_specs=pl.BlockSpec((1, c, tile_s), lambda i, j: (i, 0, j)),
        ),
        compiler_params=pltpu.CompilerParams(
            dimension_semantics=("parallel", "parallel"),
            vmem_limit_bytes=_VMEM_LIMIT_BYTES,
        ),
    )(x_in)

    if s_pad != s:
        out = out[:, :, :s]
    return out.reshape(orig_shape)


def normalize(x, power=2):
    """L^power normalization over axis 1 (matches PyTorch `Normalize.forward`)."""
    if x.ndim == 2:
        return _normalize_2d(x, power)
    return _normalize_nd(x, power)


# ---------------------------------------------------------------------------
# Self-test
# ---------------------------------------------------------------------------
if __name__ == "__main__":
    key = jax.random.PRNGKey(0)
    k2d, k4d, kgp = jax.random.split(key, 3)

    # 2D feature embeddings (how cifar_utils uses Normalize): (N, D), power=2.
    x2 = jax.random.normal(k2d, (32, 128), dtype=jnp.float32)
    out2 = jax.block_until_ready(normalize(x2, power=2))
    ref2 = x2 / jnp.power(jnp.sum(x2 ** 2, axis=1, keepdims=True), 0.5)
    assert jnp.allclose(out2, ref2, atol=1e-5, rtol=1e-4), "2D mismatch vs reference"

    # 4D NCHW input (exercises the channel-axis 3D kernel), same dim-1 semantics.
    x4 = jax.random.normal(k4d, (2, 4, 16, 16), dtype=jnp.float32)
    out4 = jax.block_until_ready(normalize(x4, power=2))
    ref4 = x4 / jnp.power(jnp.sum(x4 ** 2, axis=1, keepdims=True), 0.5)
    assert jnp.allclose(out4, ref4, atol=1e-5, rtol=1e-4), "4D mismatch vs reference"

    # General-power path (integer power != 2) via repeated multiplies + exp/log root.
    xg = jax.random.normal(kgp, (16, 128), dtype=jnp.float32)
    outg = jax.block_until_ready(normalize(xg, power=4))
    refg = xg / jnp.power(jnp.sum(xg ** 4, axis=1, keepdims=True), 0.25)
    assert jnp.allclose(outg, refg, atol=1e-4, rtol=1e-3), "power=4 mismatch vs reference"

    print("KERNEL_OK")
</pallas_src>

<mosaic_0001>
module attributes {stable_mosaic.version = 11 : i64} {
  func.func @_normalize2d_kernel(%arg0: i32, %arg1: memref<16x128xf32, #tpu.memory_space<vmem>>, %arg2: memref<16x128xf32, #tpu.memory_space<vmem>>) attributes {dimension_semantics = [#tpu.dimension_semantics<parallel>], iteration_bounds = array<i64: 2>, scalar_prefetch = 0 : i64, scratch_operands = 0 : i64, tpu.core_type = #tpu.core_type<tc>, window_params = [{transform_indices = @transform_0, window_bounds = array<i64: 16, 128>}, {transform_indices = @transform_1, window_bounds = array<i64: 16, 128>}]} {
    %c0 = arith.constant 0 : index
    %c0_0 = arith.constant 0 : index
    %0 = vector.load %arg1[%c0, %c0_0] : memref<16x128xf32, #tpu.memory_space<vmem>>, vector<16x128xf32>
    %1 = arith.mulf %0, %0 : vector<16x128xf32>
    %cst = arith.constant dense<0.000000e+00> : vector<16xf32>
    %2 = vector.multi_reduction <add>, %1, %cst [1] : vector<16x128xf32> to vector<16xf32>
    %3 = vector.shape_cast %2 : vector<16xf32> to vector<16x1xf32>
    %4 = math.rsqrt %3 : vector<16x1xf32>
    %5 = vector.broadcast %4 : vector<16x1xf32> to vector<16x128xf32>
    %6 = arith.mulf %0, %5 : vector<16x128xf32>
    %c0_1 = arith.constant 0 : index
    %c0_2 = arith.constant 0 : index
    %7 = vector.load %arg2[%c0_1, %c0_2] : memref<16x128xf32, #tpu.memory_space<vmem>>, vector<16x128xf32>
    tpu.vector_store %arg2[%c0_1, %c0_2], %6 {strides = array<i32>} : memref<16x128xf32, #tpu.memory_space<vmem>>, vector<16x128xf32>,
    return
  }
  func.func @transform_0(%arg0: i32) -> (i32, i32) {
    %c0_i32 = arith.constant 0 : i32
    %c0_i32_0 = arith.constant 0 : i32
    return %arg0, %c0_i32 : i32, i32
  }
  func.func @transform_1(%arg0: i32) -> (i32, i32) {
    %c0_i32 = arith.constant 0 : i32
    %c0_i32_0 = arith.constant 0 : i32
    return %arg0, %c0_i32 : i32, i32
  }
}

</mosaic_0001>

<bundles_post_ra>
// kernel: tpu_custom_call.1
= control target key start
LH: loop header
LB: loop body
LE: loop exit
PB: predicated region body
PF: predicated region fallthrough
CT: control target
= control target key end

     0   :  { %6 = vsyncpa [#allocation3], 0  ;;  %s584_s0 = inlined_call_operand.hbm [shape: f32[32,128], index: 0, kind: input, shape index: {}]   ;;  %s585_s1 = inlined_call_operand.hbm [shape: f32[32,128], index: 1, kind: output, shape index: {}]  }
   0x1   :  { %8 = vsyncpa [#allocation3 + $0x1], 0 }
   0x2   :  { %9 = vsyncpa [#allocation4], 0 }
   0x3   :  { %11 = vsyncpa [#allocation4 + $0x1], 0  ;;  %s422_s6 = smov 0   ;;  %s424_s7 = smov 0  }
   0x4   :  { %s426_s8 = smov 0   ;;  %s428_s9 = smov 0  }
   0x5 LB: > { %s443_s10 = sadd.s32 4294967295, %s404_s9   ;;  %s238_s11 = sadd.s32 4294967294, %s404_s9   ;;  %s404_s9 = sphi %s428_s9, %s598_s9   ;;  %s400_s8 = sphi %s426_s8, %s597_s8   ;;  %s396_s7 = sphi %s424_s7, %s596_s7   ;;  %s392_s6 = sphi %s422_s6, %s595_s6  }
   0x6   : > { %s447_s12 = sadd.s32 1, %s404_s9   ;;  %s24_s13 = sadd.s32 1, %s400_s8 }
   0x7   : > { %s21_s14 = ssub.s32 %s404_s9, %s447_s12  ;;  %p31_p0 = scmp.ne.s32.totalorder %s400_s8, %s396_s7 }
   0x8   : > { %p22_p1 = scmp.eq.s32.totalorder %s21_s14, 0  ;;  %p32_p2 = scmp.eq.s32.totalorder %s404_s9, 0 }
   0x9   : > { %p37_p3 = scmp.ne.s32.totalorder %s396_s7, %s392_s6  ;;  %p38_p4 = scmp.eq.s32.totalorder %s443_s10, 0 }
   0xa   : > { %s459_s15 = scalar_select %p22_p1, %s400_s8, %s24_s13  }
   0xb   : > { %p461_p5 = por %p32_p2, %p31_p0  ;;  %p465_p6 = por %p38_p4, %p37_p3 }
   0xc   : > { %p61_p7 = scmp.eq.s32.totalorder %s443_s10, 1  ;;  %p67_p8 = scmp.eq.s32.totalorder %s238_s11, 1 }
   0xd   : > { %p266_p10 = scmp.lt.s32.totalorder %s404_s9, 2  ;;  %s87_s20 = sand.u32 1, %s400_s8  }
   0xe   : > { %p472_p11 = por %p61_p7, %p31_p0  ;;  %p476_p12 = por %p67_p8, %p37_p3 }
   0xf   : > { %s252_s21 = sshll.u32 %s404_s9, 8  ;;  %s241_s22 = sshll.u32 %s87_s20, 4 }
  0x10   : > { %s589_s18 = scalar_select %p472_p11, 1, 0 }
  0x11   : > { %s590_s19 = scalar_select %p476_p12, 1, 0 }
  0x12   : > { %s485_s25 = scalar_lea.hbm %s584_s0, %s252_s21  ;;  %s91_s26 = scalar_lea.vmem [#allocation2], %s241_s22 }
  0x13   : > { %s98_s27 = sshll.u32 %s91_s26, 4  ;;  %p489_p13 = pnand %p266_p10, %p461_p5  ;;  %s493_s27 = int_to_ptr.vmem [resolvable:$true] %s98_s27 }
  0x14   : > { %s495_s29 = scalar_lea.sflag [#allocation3], %s87_s20  ;;  %s308_s30 = scalar_lea.hbm %s485_s25, 256 }
  0x15   : > { %p309_p0 = scmp.ne.s32.totalorder %s485_s25, %s308_s30  ;;  %p310_p1 = pneg %p489_p13 }
  0x16   : > { %s313_s4 = scalar_lea.hbm %s584_s0, 512  ;;  %p314_p4 = scmp.lt.u32.totalorder %s485_s25, %s584_s0 }
  0x17   : > { %p311_p2 = pnand %p310_p1, %p309_p0  ;;  %p315_p5 = scmp.lt.u32.totalorder %s313_s4, %s308_s30 }
  0x18   : > { %p317_p8 = scmp.lt.u32.totalorder %s308_s30, %s485_s25 }
  0x19   : > { %p312_p3 = pneg %p311_p2  ;;  %p316_p7 = por %p315_p5, %p314_p4 }
  0x1b   : > { %p318_p10 = por %p317_p8, %p316_p7 }
  0x1d   : > { %p319_p9 = pnand %p318_p10, %p312_p3 }
  0x1f   : > { %322 = shalt.err (!%p319_p9)
}
  0x20   : > { %s323_s13 = scalar_lea.vmem %s493_s27, 256  ;;  %s406_s14 = smov [#allocation2]  }
  0x21   : > { %p324_p0 = scmp.ne.s32.totalorder %s493_s27, %s323_s13  ;;  %s328_s16 = sshll.u32 %s406_s14, 4  ;;  %s329_s16 = int_to_ptr.vmem [resolvable:$false] %s328_s16 }
  0x22   : > { %s330_s20 = scalar_lea.vmem %s329_s16, 512  ;;  %p331_p11 = scmp.lt.s32.totalorder %s493_s27, %s329_s16 }
  0x23   : > { %p326_p2 = pnand %p324_p0, %p310_p1  ;;  %p332_p4 = scmp.lt.s32.totalorder %s330_s20, %s323_s13 }
  0x25   : > { %p327_p12 = pneg %p326_p2  ;;  %p333_p5 = por %p332_p4, %p331_p11 }
  0x27   : > { %p334_p7 = pnand %p333_p5, %p327_p12 }
  0x29   : > { %337 = shalt.err (!%p334_p7)
}
  0x2a   : > { %s407_s21 = smov 128   ;;  %s408_s22 = smov 8  }
  0x2b   : > { %261 = dma.hbm_to_vmem [thread:$0]  (!%p489_p13), %s485_s25, 256, %s493_s27, %s495_s29, %s407_s21, %s407_s21, %s408_s22  }
  0x2c   : > { %p244_p9 = scmp.ge.s32.totalorder %s404_s9, 1  ;;  %p106_p1 = scmp.lt.s32.totalorder %s404_s9, 3 }
  0x2e   : > { %p107_p3 = pnand %p244_p9, %p106_p1 }
  0x2f   : > { %s526_s23 = sand.u32 (!%p107_p3), 1, %s396_s7  }
  0x30   : > { %110 = sbr.rel (%p107_p3) target bundleno = 233 (0xe9), region = 24  ;;  %s245_s24 = sshll.u32 (!%p107_p3), %s526_s23, 4 }
  0x31   : > { %s113_s26 = scalar_lea.sflag (!%p107_p3), [#allocation3], %s526_s23  ;;  %s116_s30 = scalar_lea.vmem (!%p107_p3), [#allocation2], %s245_s24 }
  0x37   : > { %383 = dma.done.wait (%p465_p6), %s113_s26, 256  }
  0x38   : > { %385 = vsyncadd (%p465_p6), %s113_s26, 4294967040  ;;  %v137_v0 = vld [vmem:[%s116_s30] sm:$0xff]  ;;  %v138_v1 = vld [vmem:[%s116_s30 + $0x8] sm:$0xff]  ;;  %s253_s25 = sshll.u32 %s443_s10, 8  ;;  %s134_s27 = scalar_lea.vmem [#allocation5], %s245_s24 }
  0x39   : > { %v139_v2 = vmul.f32 %v137_v0, %v137_v0  ;;  %v140_v3 = vmul.f32 %v138_v1, %v138_v1  ;;  %s165_s28 = sshll.u32 %s134_s27, 4  ;;  %s538_s2 = scalar_lea.hbm %s585_s1, %s253_s25  ;;  %s540_s28 = int_to_ptr.vmem [resolvable:$true] %s165_s28 }
  0x3a   : > { %s152_s3 = scalar_lea.sflag [#allocation4], %s526_s23  ;;  %s338_s4 = scalar_lea.vmem %s540_s28, 256 }
  0x3b   : > { %141 = vadd.xlane.f32.xlu0 %v139_v2  ;;  %p339_p6 = scmp.ne.s32.totalorder %s540_s28, %s338_s4  ;;  %p592_p11 = scmp.ne.s32.totalorder %s589_s18, 0 }
  0x3c   : > { %s409_s10 = smov [#allocation5]  }
  0x3d   : > { %p340_p12 = pnand %p339_p6, %p592_p11  ;;  %s342_s5 = sshll.u32 %s409_s10, 4  ;;  %s343_s5 = int_to_ptr.vmem [resolvable:$false] %s342_s5 }
  0x3e   : > { %s344_s11 = scalar_lea.vmem %s343_s5, 512  ;;  %p345_p8 = scmp.lt.s32.totalorder %s540_s28, %s343_s5 }
  0x3f   : > { %143 = vadd.xlane.f32.xlu0 %v140_v3  ;;  %p341_p13 = pneg %p340_p12  ;;  %p346_p10 = scmp.lt.s32.totalorder %s344_s11, %s338_s4 }
  0x41   : > { %p347_p0 = por %p346_p10, %p345_p8 }
  0x43   : > { %p348_p2 = pnand %p347_p0, %p341_p13 }
  0xc8   : > { %v142_v4 = vpop.xlane.xlu0 %141 }
  0xc9   : > { %304 = vrsqrt.f32 %v142_v4 }
  0xcc   : > { %v144_v5 = vpop.xlane.xlu0 %143 }
  0xcd   : > { %306 = vrsqrt.f32 %v144_v5 }
  0xd3   : > { %v305_v6 = vpop.eup %304 }
  0xd4   : > { %v147_v7 = vmul.f32 %v305_v6, %v137_v0 }
  0xd6   : > { %149 = vst [vmem:[%s134_s27] sm:$0xff] %v147_v7 }
  0xd7   : > { %v307_v8 = vpop.eup %306 }
  0xd8   : > { %v148_v9 = vmul.f32 %v307_v8, %v138_v1 }
  0xda   : > { %150 = vst [vmem:[%s134_s27 + $0x8] sm:$0xff] %v148_v9 }
  0xdb   : > { %351 = shalt.err (!%p348_p2)
}
  0xdc   : > { %s352_s13 = scalar_lea.hbm %s538_s2, 256  ;;  %s356_s20 = scalar_lea.hbm %s585_s1, 512 }
  0xdd   : > { %p353_p4 = scmp.ne.s32.totalorder %s538_s2, %s352_s13  ;;  %p357_p9 = scmp.lt.u32.totalorder %s538_s2, %s585_s1 }
  0xde   : > { %p358_p1 = scmp.lt.u32.totalorder %s356_s20, %s352_s13  ;;  %p360_p6 = scmp.lt.u32.totalorder %s352_s13, %s538_s2 }
  0xdf   : > { %p354_p5 = pnand %p353_p4, %p592_p11 }
  0xe0   : > { %p359_p3 = por %p358_p1, %p357_p9 }
  0xe1   : > { %p355_p7 = pneg %p354_p5 }
  0xe2   : > { %p361_p12 = por %p360_p6, %p359_p3 }
  0xe4   : > { %p362_p13 = pnand %p361_p12, %p355_p7 }
  0xe6   : > { %365 = shalt.err (!%p362_p13)
}
  0xe7   : > { %s410_s24 = smov 128   ;;  %s411_s26 = smov 8  }
  0xe8   : > { %256 = dma.vmem_to_hbm [thread:$0]  (%p592_p11), %s540_s28, 256, %s538_s2, %s152_s3, %s410_s24, %s410_s24, %s411_s26  }
  0xe9 PF: > { %s180_s30 = sand.u32 1, %s392_s6   ;;  %p593_p8 = scmp.ne.s32.totalorder %s590_s19, 0 }
  0xea   : > { %p594_p10 = scmp.ge.s32.totalorder %s404_s9, 2  ;;  %s181_s25 = scalar_lea.sflag [#allocation4], %s180_s30 }
  0xec   : > { %p263_p0 = pnand %p594_p10, %p593_p8 }
  0xee   : > { %387 = dma.done.wait (!%p263_p0), %s181_s25, 256  }
  0xef   : > { %389 = vsyncadd (!%p263_p0), %s181_s25, 4294967040  ;;  %p14_p2 = scmp.ge.s32.totalorder %s447_s12, 4   ;;  %s595_s6 = smov %s396_s7 }
  0xf0   : > { %s596_s7 = smov %s400_s8  ;;  %s597_s8 = smov %s459_s15 }
  0xf1   : > { %s598_s9 = smov %s447_s12  ;;  %16 = sbr.rel (!%p14_p2) target bundleno = 5 (0x5), region = 69 }
  0xf8   :  { %186 = vsyncpa [#allocation3], 1 }
  0xf9   :  { %188 = vsyncpa [#allocation3 + $0x1], 1 }
  0xfa   :  { %189 = vsyncpa [#allocation4], 1 }
  0xfb   :  { %191 = vsyncpa [#allocation4 + $0x1], 1 }

</bundles_post_ra>
